<compile_context>
chip_gen: v6e
topology: v6e:2x2x1
jax: 0.10.0
libtpu: 0.0.40
codegen_flags: <defaults>
</compile_context>

<pallas_src>
import functools
import math

import jax
import jax.numpy as jnp
from jax import lax
from jax.experimental import pallas as pl
from jax.experimental.pallas import tpu as pltpu

LN_EPS = 1e-5


def _round_up(x, m):
    return ((x + m - 1) // m) * m


def _contrastive_head_kernel(x_ref, w1_ref, b1_ref, g_ref, beta_ref,
                             w2_ref, b2_ref, o_ref, *, d_in, d_in_p):
    # x_ref: (tm, d_in_p) row tile. Weight/bias blocks are full and constant
    # across the grid (their index_map never changes).
    x = x_ref[...]                                  # native dtype -> MXU directly
    h = jnp.dot(x, w1_ref[...],
                preferred_element_type=jnp.float32) + b1_ref[...]   # f32

    # LayerNorm over the *true* d_in features (padded columns of h are zero
    # because W1/b1 padding is zero).
    inv_d = jnp.float32(1.0 / d_in)
    mean = jnp.sum(h, axis=-1, keepdims=True) * inv_d
    centered = h - mean
    if d_in_p != d_in:
        col = lax.broadcasted_iota(jnp.int32, (1, d_in_p), 1)
        centered_v = jnp.where(col < d_in, centered, 0.0)
    else:
        centered_v = centered
    var = jnp.sum(centered_v * centered_v, axis=-1, keepdims=True) * inv_d
    h_norm = centered * lax.rsqrt(var + LN_EPS) * g_ref[...] + beta_ref[...]

    # ReLU, then cast back to the weight dtype so the 2nd matmul is MXU-native.
    h_act = jnp.maximum(h_norm, 0.0).astype(w2_ref.dtype)

    out = jnp.dot(h_act, w2_ref[...], preferred_element_type=jnp.float32)
    out = out + b2_ref[...]
    o_ref[...] = out.astype(o_ref.dtype)


def contrastive_head(x, w1, b1, gamma, beta, w2, b2, *, tm=256):
    """x: (..., d_in) -> (..., d_out).

    Weights are stored pre-transposed: w1 (d_in, d_in), w2 (d_in, d_out) so the
    kernel computes x @ W (== PyTorch x @ W.T).
    """
    d_in = x.shape[-1]
    d_out = w2.shape[1]
    lead = x.shape[:-1]
    n_rows = int(math.prod(lead)) if lead else 1
    x2d = x.reshape(n_rows, d_in)

    # Lane-dense feature dims: pad to multiples of 128 (sliced off afterwards).
    d_in_p = _round_up(d_in, 128)
    d_out_p = _round_up(d_out, 128)

    # Row tile: large for MXU/DMA efficiency, multiple of 8, capped by problem
    # size and by a VMEM budget that is safe on v7x (64 MiB physical).
    tm_eff = min(tm, _round_up(n_rows, 8))
    tm_eff = max(8, (tm_eff // 8) * 8)

    x_isz = jnp.dtype(x.dtype).itemsize
    w_isz = jnp.dtype(w1.dtype).itemsize

    def _vmem_needed(t):
        io = 2 * t * (d_in_p + d_out_p) * x_isz                 # dbl-buffered x/out
        wts = 2 * (d_in_p * d_in_p + d_in_p * d_out_p) * w_isz  # resident weights
        misc = 2 * (3 * d_in_p + d_out_p) * 4                   # biases / LN affine
        return io + wts + misc

    vmem_budget = 48 * 1024 * 1024
    while _vmem_needed(tm_eff) > vmem_budget and tm_eff > 128:
        tm_eff = max(128, tm_eff // 2)

    n_rows_p = _round_up(n_rows, tm_eff)

    # Zero-pad everything. Padded h columns stay exactly zero; padded output
    # rows/cols are sliced off below. LN affine params padded with zeros so
    # padded columns contribute nothing downstream.
    xp = jnp.zeros((n_rows_p, d_in_p), x.dtype).at[:n_rows, :d_in].set(x2d)
    w1p = jnp.zeros((d_in_p, d_in_p), w1.dtype).at[:d_in, :d_in].set(w1)
    w2p = jnp.zeros((d_in_p, d_out_p), w2.dtype).at[:d_in, :d_out].set(w2)
    b1p = jnp.zeros((1, d_in_p), jnp.float32).at[0, :d_in].set(b1.astype(jnp.float32))
    gp = jnp.zeros((1, d_in_p), jnp.float32).at[0, :d_in].set(gamma.astype(jnp.float32))
    bp = jnp.zeros((1, d_in_p), jnp.float32).at[0, :d_in].set(beta.astype(jnp.float32))
    b2p = jnp.zeros((1, d_out_p), jnp.float32).at[0, :d_out].set(b2.astype(jnp.float32))

    grid = (n_rows_p // tm_eff,)

    cost = pl.CostEstimate(
        flops=2 * n_rows * d_in * (d_in + d_out),
        transcendentals=n_rows,
        bytes_accessed=(xp.size * x_isz + n_rows_p * d_out_p * x_isz
                        + (w1p.size + w2p.size) * w_isz),
    )

    kernel = functools.partial(_contrastive_head_kernel, d_in=d_in, d_in_p=d_in_p)

    out2d = pl.pallas_call(
        kernel,
        out_shape=jax.ShapeDtypeStruct((n_rows_p, d_out_p), x.dtype),
        grid=grid,
        in_specs=[
            pl.BlockSpec((tm_eff, d_in_p), lambda i: (i, 0)),    # x row tile
            pl.BlockSpec((d_in_p, d_in_p), lambda i: (0, 0)),    # W1 (resident)
            pl.BlockSpec((1, d_in_p), lambda i: (0, 0)),         # b1
            pl.BlockSpec((1, d_in_p), lambda i: (0, 0)),         # LN gamma
            pl.BlockSpec((1, d_in_p), lambda i: (0, 0)),         # LN beta
            pl.BlockSpec((d_in_p, d_out_p), lambda i: (0, 0)),   # W2 (resident)
            pl.BlockSpec((1, d_out_p), lambda i: (0, 0)),        # b2
        ],
        out_specs=pl.BlockSpec((tm_eff, d_out_p), lambda i: (i, 0)),
        compiler_params=pltpu.CompilerParams(
            dimension_semantics=("parallel",),
            vmem_limit_bytes=int(min(64 * 1024 * 1024,
                                     max(32 * 1024 * 1024,
                                         int(_vmem_needed(tm_eff) * 1.25)))),
        ),
        cost_estimate=cost,
    )(xp, w1p, b1p, gp, bp, w2p, b2p)

    return out2d[:n_rows, :d_out].reshape(*lead, d_out)


def _reference(x, w1, b1, gamma, beta, w2, b2):
    h = x.astype(jnp.float32) @ w1.astype(jnp.float32) + b1.astype(jnp.float32)
    mean = jnp.mean(h, axis=-1, keepdims=True)
    var = jnp.mean((h - mean) ** 2, axis=-1, keepdims=True)
    h = (h - mean) * lax.rsqrt(var + LN_EPS) * gamma.astype(jnp.float32) \
        + beta.astype(jnp.float32)
    h = jnp.maximum(h, 0.0)
    return h @ w2.astype(jnp.float32) + b2.astype(jnp.float32)


def _make_params(key, d_in, d_out, dtype):
    kw1, kb1, kw2, kb2 = jax.random.split(key, 4)
    bound = 1.0 / jnp.sqrt(d_in)
    w1 = jax.random.uniform(kw1, (d_in, d_in), jnp.float32, -bound, bound).astype(dtype)
    b1 = jax.random.uniform(kb1, (d_in,), jnp.float32, -bound, bound)
    w2 = jax.random.uniform(kw2, (d_in, d_out), jnp.float32, -bound, bound).astype(dtype)
    b2 = jax.random.uniform(kb2, (d_out,), jnp.float32, -bound, bound)
    gamma = jnp.ones((d_in,), jnp.float32)
    beta = jnp.zeros((d_in,), jnp.float32)
    return w1, b1, gamma, beta, w2, b2


if __name__ == "__main__":
    key = jax.random.PRNGKey(0)
    k1, k2, k3, k4 = jax.random.split(key, 4)

    fn = jax.jit(functools.partial(contrastive_head, tm=256))

    # --- test 1: small f32 shapes matching the module (batch=2, seq=8, d_in=32 -> d_out=16)
    batch, seq, d_in, d_out = 2, 8, 32, 16
    x = jax.random.normal(k1, (batch, seq, d_in), dtype=jnp.float32)
    params = _make_params(k2, d_in, d_out, jnp.float32)
    out = jax.block_until_ready(fn(x, *params))
    ref = _reference(x, *params)
    assert out.shape == (batch, seq, d_in)[:2] + (d_out,)
    assert jnp.allclose(out, ref, atol=1e-4, rtol=1e-4), "f32 mismatch vs reference"

    # --- test 2: bf16 path with lane-aligned dims (no padding branch)
    batch2, seq2, d_in2, d_out2 = 4, 32, 256, 128
    xb = jax.random.normal(k3, (batch2, seq2, d_in2), dtype=jnp.bfloat16)
    params_b = _make_params(k4, d_in2, d_out2, jnp.bfloat16)
    out_b = jax.block_until_ready(fn(xb, *params_b))
    ref_b = _reference(xb, *params_b)
    assert out_b.shape == (batch2, seq2, d_out2)
    assert jnp.allclose(out_b.astype(jnp.float32), ref_b, atol=3e-2, rtol=3e-2), \
        "bf16 mismatch vs reference"

    print("KERNEL_OK")
</pallas_src>

<mosaic_0001>
module attributes {stable_mosaic.version = 11 : i64} {
  func.func @_contrastive_head_kernel(%arg0: i32, %arg1: memref<16x128xf32, #tpu.memory_space<vmem>>, %arg2: memref<128x128xf32, #tpu.memory_space<vmem>>, %arg3: memref<1x128xf32, #tpu.memory_space<vmem>>, %arg4: memref<1x128xf32, #tpu.memory_space<vmem>>, %arg5: memref<1x128xf32, #tpu.memory_space<vmem>>, %arg6: memref<128x128xf32, #tpu.memory_space<vmem>>, %arg7: memref<1x128xf32, #tpu.memory_space<vmem>>, %arg8: memref<16x128xf32, #tpu.memory_space<vmem>>) attributes {dimension_semantics = [#tpu.dimension_semantics<parallel>], iteration_bounds = array<i64: 1>, scalar_prefetch = 0 : i64, scratch_operands = 0 : i64, tpu.core_type = #tpu.core_type<tc>, window_params = [{transform_indices = @transform_0, window_bounds = array<i64: 16, 128>}, {pipeline_mode = #tpu.pipeline_mode<synchronous>, transform_indices = @transform_1, window_bounds = array<i64: 128, 128>}, {pipeline_mode = #tpu.pipeline_mode<synchronous>, transform_indices = @transform_2, window_bounds = array<i64: 1, 128>}, {pipeline_mode = #tpu.pipeline_mode<synchronous>, transform_indices = @transform_3, window_bounds = array<i64: 1, 128>}, {pipeline_mode = #tpu.pipeline_mode<synchronous>, transform_indices = @transform_4, window_bounds = array<i64: 1, 128>}, {pipeline_mode = #tpu.pipeline_mode<synchronous>, transform_indices = @transform_5, window_bounds = array<i64: 128, 128>}, {pipeline_mode = #tpu.pipeline_mode<synchronous>, transform_indices = @transform_6, window_bounds = array<i64: 1, 128>}, {transform_indices = @transform_7, window_bounds = array<i64: 16, 128>}]} {
    %c0 = arith.constant 0 : index
    %c0_0 = arith.constant 0 : index
    %0 = vector.load %arg1[%c0, %c0_0] : memref<16x128xf32, #tpu.memory_space<vmem>>, vector<16x128xf32>
    %c0_1 = arith.constant 0 : index
    %c0_2 = arith.constant 0 : index
    %1 = vector.load %arg2[%c0_1, %c0_2] : memref<128x128xf32, #tpu.memory_space<vmem>>, vector<128x128xf32>
    %cst = arith.constant dense<0.000000e+00> : vector<16x128xf32>
    %2 = tpu.matmul %0, %1, %cst {dimension_numbers = #tpu.dot_dimension_numbers<[1], [0], [0], [1], [0, 0, 1, 1], [], []>} : vector<16x128xf32>, vector<128x128xf32>, vector<16x128xf32> -> vector<16x128xf32>
    %c0_3 = arith.constant 0 : index
    %c0_4 = arith.constant 0 : index
    %3 = vector.load %arg3[%c0_3, %c0_4] : memref<1x128xf32, #tpu.memory_space<vmem>>, vector<1x128xf32>
    %4 = vector.broadcast %3 : vector<1x128xf32> to vector<16x128xf32>
    %5 = arith.addf %2, %4 : vector<16x128xf32>
    %cst_5 = arith.constant dense<0.000000e+00> : vector<16xf32>
    %6 = vector.multi_reduction <add>, %5, %cst_5 [1] : vector<16x128xf32> to vector<16xf32>
    %7 = vector.shape_cast %6 : vector<16xf32> to vector<16x1xf32>
    %cst_6 = arith.constant 3.125000e-02 : f32
    %8 = vector.broadcast %cst_6 : f32 to vector<16x1xf32>
    %9 = arith.mulf %7, %8 : vector<16x1xf32>
    %10 = vector.broadcast %9 : vector<16x1xf32> to vector<16x128xf32>
    %11 = arith.subf %5, %10 : vector<16x128xf32>
    %12 = tpu.iota {dimensions = array<i32: 1>} : vector<1x128xi32>
    %c32_i32 = arith.constant 32 : i32
    %13 = vector.broadcast %c32_i32 : i32 to vector<1x128xi32>
    %14 = arith.cmpi slt, %12, %13 : vector<1x128xi32>
    %cst_7 = arith.constant 0.000000e+00 : f32
    %15 = vector.shape_cast %14 : vector<1x128xi1> to vector<1x128xi1>
    %16 = vector.broadcast %15 : vector<1x128xi1> to vector<16x128xi1>
    %17 = vector.broadcast %cst_7 : f32 to vector<16x128xf32>
    %18 = arith.select %16, %11, %17 : vector<16x128xi1>, vector<16x128xf32>
    %19 = arith.mulf %18, %18 : vector<16x128xf32>
    %cst_8 = arith.constant dense<0.000000e+00> : vector<16xf32>
    %20 = vector.multi_reduction <add>, %19, %cst_8 [1] : vector<16x128xf32> to vector<16xf32>
    %21 = vector.shape_cast %20 : vector<16xf32> to vector<16x1xf32>
    %cst_9 = arith.constant 3.125000e-02 : f32
    %22 = vector.broadcast %cst_9 : f32 to vector<16x1xf32>
    %23 = arith.mulf %21, %22 : vector<16x1xf32>
    %cst_10 = arith.constant 9.99999974E-6 : f32
    %24 = vector.broadcast %cst_10 : f32 to vector<16x1xf32>
    %25 = arith.addf %23, %24 : vector<16x1xf32>
    %26 = math.rsqrt %25 : vector<16x1xf32>
    %27 = vector.broadcast %26 : vector<16x1xf32> to vector<16x128xf32>
    %28 = arith.mulf %11, %27 : vector<16x128xf32>
    %c0_11 = arith.constant 0 : index
    %c0_12 = arith.constant 0 : index
    %29 = vector.load %arg4[%c0_11, %c0_12] : memref<1x128xf32, #tpu.memory_space<vmem>>, vector<1x128xf32>
    %30 = vector.broadcast %29 : vector<1x128xf32> to vector<16x128xf32>
    %31 = arith.mulf %28, %30 : vector<16x128xf32>
    %c0_13 = arith.constant 0 : index
    %c0_14 = arith.constant 0 : index
    %32 = vector.load %arg5[%c0_13, %c0_14] : memref<1x128xf32, #tpu.memory_space<vmem>>, vector<1x128xf32>
    %33 = vector.broadcast %32 : vector<1x128xf32> to vector<16x128xf32>
    %34 = arith.addf %31, %33 : vector<16x128xf32>
    %cst_15 = arith.constant 0.000000e+00 : f32
    %35 = vector.broadcast %cst_15 : f32 to vector<16x128xf32>
    %36 = arith.maximumf %34, %35 : vector<16x128xf32>
    %c0_16 = arith.constant 0 : index
    %c0_17 = arith.constant 0 : index
    %37 = vector.load %arg6[%c0_16, %c0_17] : memref<128x128xf32, #tpu.memory_space<vmem>>, vector<128x128xf32>
    %cst_18 = arith.constant dense<0.000000e+00> : vector<16x128xf32>
    %38 = tpu.matmul %36, %37, %cst_18 {dimension_numbers = #tpu.dot_dimension_numbers<[1], [0], [0], [1], [0, 0, 1, 1], [], []>} : vector<16x128xf32>, vector<128x128xf32>, vector<16x128xf32> -> vector<16x128xf32>
    %c0_19 = arith.constant 0 : index
    %c0_20 = arith.constant 0 : index
    %39 = vector.load %arg7[%c0_19, %c0_20] : memref<1x128xf32, #tpu.memory_space<vmem>>, vector<1x128xf32>
    %40 = vector.broadcast %39 : vector<1x128xf32> to vector<16x128xf32>
    %41 = arith.addf %38, %40 : vector<16x128xf32>
    %c0_21 = arith.constant 0 : index
    %c0_22 = arith.constant 0 : index
    %42 = vector.load %arg8[%c0_21, %c0_22] : memref<16x128xf32, #tpu.memory_space<vmem>>, vector<16x128xf32>
    tpu.vector_store %arg8[%c0_21, %c0_22], %41 {strides = array<i32>} : memref<16x128xf32, #tpu.memory_space<vmem>>, vector<16x128xf32>,
    return
  }
  func.func @transform_0(%arg0: i32) -> (i32, i32) {
    %c0_i32 = arith.constant 0 : i32
    %c0_i32_0 = arith.constant 0 : i32
    return %arg0, %c0_i32 : i32, i32
  }
  func.func @transform_1(%arg0: i32) -> (i32, i32) {
    %c0_i32 = arith.constant 0 : i32
    %c0_i32_0 = arith.constant 0 : i32
    %c0_i32_1 = arith.constant 0 : i32
    return %c0_i32, %c0_i32_0 : i32, i32
  }
  func.func @transform_2(%arg0: i32) -> (i32, i32) {
    %c0_i32 = arith.constant 0 : i32
    %c0_i32_0 = arith.constant 0 : i32
    %c0_i32_1 = arith.constant 0 : i32
    return %c0_i32, %c0_i32_0 : i32, i32
  }
  func.func @transform_3(%arg0: i32) -> (i32, i32) {
    %c0_i32 = arith.constant 0 : i32
    %c0_i32_0 = arith.constant 0 : i32
    %c0_i32_1 = arith.constant 0 : i32
    return %c0_i32, %c0_i32_0 : i32, i32
  }
  func.func @transform_4(%arg0: i32) -> (i32, i32) {
    %c0_i32 = arith.constant 0 : i32
    %c0_i32_0 = arith.constant 0 : i32
    %c0_i32_1 = arith.constant 0 : i32
    return %c0_i32, %c0_i32_0 : i32, i32
  }
  func.func @transform_5(%arg0: i32) -> (i32, i32) {
    %c0_i32 = arith.constant 0 : i32
    %c0_i32_0 = arith.constant 0 : i32
    %c0_i32_1 = arith.constant 0 : i32
    return %c0_i32, %c0_i32_0 : i32, i32
  }
  func.func @transform_6(%arg0: i32) -> (i32, i32) {
    %c0_i32 = arith.constant 0 : i32
    %c0_i32_0 = arith.constant 0 : i32
    %c0_i32_1 = arith.constant 0 : i32
    return %c0_i32, %c0_i32_0 : i32, i32
  }
  func.func @transform_7(%arg0: i32) -> (i32, i32) {
    %c0_i32 = arith.constant 0 : i32
    %c0_i32_0 = arith.constant 0 : i32
    return %arg0, %c0_i32 : i32, i32
  }
}

</mosaic_0001>

<bundles_post_ra>
// kernel: contrastive_head.1
= control target key start
LH: loop header
LB: loop body
LE: loop exit
PB: predicated region body
PF: predicated region fallthrough
CT: control target
= control target key end

     0   :  { %v134_v24 = vlaneseq  ;;  %s561_s1 = inlined_call_operand.vmem [shape: f32[128,128], index: 1, kind: input, shape index: {}]   ;;  %s562_s0 = inlined_call_operand.vmem [shape: f32[16,128], index: 0, kind: input, shape index: {}]   ;;  %s563_s2 = inlined_call_operand.vmem [shape: f32[1,128], index: 2, kind: input, shape index: {}]   ;;  %s564_s5 = inlined_call_operand.vmem [shape: f32[128,128], index: 5, kind: input, shape index: {}]   ;;  %s565_s3 = inlined_call_operand.vmem [shape: f32[1,128], index: 3, kind: input, shape index: {}]   ;;  %s566_s4 = inlined_call_operand.vmem [shape: f32[1,128], index: 4, kind: input, shape index: {}]   ;;  %s567_s6 = inlined_call_operand.vmem [shape: f32[1,128], index: 6, kind: input, shape index: {}]   ;;  %s568_s7 = inlined_call_operand.vmem [shape: f32[16,128], index: 7, kind: output, shape index: {}]  }
   0x1   :  { %v43_v0 = vld [vmem:[%s561_s1 + $0x78] sm:$0xff]  ;;  %v42_v1 = vld [vmem:[%s561_s1 + $0x70] sm:$0xff]  ;;  %v41_v2 = vld [vmem:[%s561_s1 + $0x68] sm:$0xff] }
   0x2   :  { %319 = vmatprep.subr.mxu0 %v43_v0  ;;  %v40_v3 = vld [vmem:[%s561_s1 + $0x60] sm:$0xff]  ;;  %v39_v5 = vld [vmem:[%s561_s1 + $0x58] sm:$0xff]  ;;  %v38_v6 = vld [vmem:[%s561_s1 + $0x50] sm:$0xff]  ;;  %v135_v25 = vand.u32 127, %v134_v24 }
   0x3   :  { %320 = vmatpush3.msra.mxu0 %v43_v0  ;;  %v26_v4 = vld [vmem:[%s562_s0] sm:$0xff]  ;;  %v37_v7 = vld [vmem:[%s561_s1 + $0x48] sm:$0xff]  ;;  %v35_v9 = vld [vmem:[%s561_s1 + $0x38] sm:$0xff] }
   0x4   :  { %321 = vmatprep.subr.mxu0 %v42_v1  ;;  %351 = vmatprep.mubr.f32.mxu0 %v26_v4  ;;  %v36_v8 = vld [vmem:[%s561_s1 + $0x40] sm:$0xff]  ;;  %v34_v10 = vld [vmem:[%s561_s1 + $0x30] sm:$0xff]  ;;  %v33_v11 = vld [vmem:[%s561_s1 + $0x28] sm:$0xff]  ;;  %vm136_vm0 = vcmp.lt.s32.totalorder %v135_v25, 32 }
   0x5   :  { %322 = vmatpush3.msra.mxu0 %v42_v1  ;;  %v32_v12 = vld [vmem:[%s561_s1 + $0x20] sm:$0xff]  ;;  %v31_v13 = vld [vmem:[%s561_s1 + $0x18] sm:$0xff]  ;;  %v30_v14 = vld [vmem:[%s561_s1 + $0x10] sm:$0xff] }
   0x6   :  { %323 = vmatprep.subr.mxu0 %v41_v2  ;;  %v29_v15 = vld [vmem:[%s561_s1 + $0x8] sm:$0xff]  ;;  %v28_v16 = vld [vmem:[%s561_s1] sm:$0xff]  ;;  %v190_v23 = vld [vmem:[%s564_s5 + $0x78] sm:$0xff] }
   0x7   :  { %324 = vmatpush3.msra.mxu0 %v41_v2  ;;  %v27_v17 = vld [vmem:[%s562_s0 + $0x8] sm:$0xff]  ;;  %v279_v19 = vld [vmem:[%s563_s2] ss:$0 sm:$0xff]  ;;  %354 = vmatprep.subr.mxu1 %v190_v23  ;;  %v189_v36 = vld [vmem:[%s564_s5 + $0x70] sm:$0xff] }
   0x8   :  { %325 = vmatprep.subr.mxu0 %v40_v3  ;;  %355 = vmatpush3.msra.mxu1 %v190_v23  ;;  %v188_v37 = vld [vmem:[%s564_s5 + $0x68] sm:$0xff]  ;;  %v187_v38 = vld [vmem:[%s564_s5 + $0x60] sm:$0xff]  ;;  %v186_v39 = vld [vmem:[%s564_s5 + $0x58] sm:$0xff] }
   0x9   :  { %326 = vmatpush3.msra.mxu0 %v40_v3  ;;  %356 = vmatprep.subr.mxu1 %v189_v36  ;;  %v185_v40 = vld [vmem:[%s564_s5 + $0x50] sm:$0xff]  ;;  %v184_v41 = vld [vmem:[%s564_s5 + $0x48] sm:$0xff]  ;;  %v183_v42 = vld [vmem:[%s564_s5 + $0x40] sm:$0xff] }
   0xa   :  { %327 = vmatprep.subr.mxu0 %v39_v5  ;;  %357 = vmatpush3.msra.mxu1 %v189_v36  ;;  %v182_v43 = vld [vmem:[%s564_s5 + $0x38] sm:$0xff]  ;;  %v181_v44 = vld [vmem:[%s564_s5 + $0x30] sm:$0xff]  ;;  %v180_v45 = vld [vmem:[%s564_s5 + $0x28] sm:$0xff] }
   0xb   :  { %328 = vmatpush3.msra.mxu0 %v39_v5  ;;  %358 = vmatprep.subr.mxu1 %v188_v37  ;;  %v179_v46 = vld [vmem:[%s564_s5 + $0x20] sm:$0xff]  ;;  %v178_v47 = vld [vmem:[%s564_s5 + $0x18] sm:$0xff]  ;;  %v177_v48 = vld [vmem:[%s564_s5 + $0x10] sm:$0xff] }
   0xc   :  { %329 = vmatprep.subr.mxu0 %v38_v6  ;;  %359 = vmatpush3.msra.mxu1 %v188_v37  ;;  %v176_v49 = vld [vmem:[%s564_s5 + $0x8] sm:$0xff]  ;;  %v175_v50 = vld [vmem:[%s564_s5] sm:$0xff] }
   0xd   :  { %330 = vmatpush3.msra.mxu0 %v38_v6  ;;  %360 = vmatprep.subr.mxu1 %v187_v38  ;;  %v280_v58 = vld [vmem:[%s565_s3] ss:$0 sm:$0xff] }
   0xe   :  { %331 = vmatprep.subr.mxu0 %v37_v7  ;;  %361 = vmatpush3.msra.mxu1 %v187_v38  ;;  %v281_v60 = vld [vmem:[%s566_s4] ss:$0 sm:$0xff] }
   0xf   :  { %332 = vmatpush3.msra.mxu0 %v37_v7  ;;  %362 = vmatprep.subr.mxu1 %v186_v39  ;;  %v282_v5 = vld [vmem:[%s567_s6] ss:$0 sm:$0xff] }
  0x10   :  { %333 = vmatprep.subr.mxu0 %v36_v8  ;;  %363 = vmatpush3.msra.mxu1 %v186_v39 }
  0x11   :  { %334 = vmatpush3.msra.mxu0 %v36_v8  ;;  %364 = vmatprep.subr.mxu1 %v185_v40 }
  0x12   :  { %335 = vmatprep.subr.mxu0 %v35_v9  ;;  %365 = vmatpush3.msra.mxu1 %v185_v40 }
  0x13   :  { %336 = vmatpush3.msra.mxu0 %v35_v9  ;;  %366 = vmatprep.subr.mxu1 %v184_v41 }
  0x14   :  { %337 = vmatprep.subr.mxu0 %v34_v10  ;;  %367 = vmatpush3.msra.mxu1 %v184_v41 }
  0x15   :  { %338 = vmatpush3.msra.mxu0 %v34_v10  ;;  %368 = vmatprep.subr.mxu1 %v183_v42 }
  0x16   :  { %339 = vmatprep.subr.mxu0 %v33_v11  ;;  %369 = vmatpush3.msra.mxu1 %v183_v42 }
  0x17   :  { %340 = vmatpush3.msra.mxu0 %v33_v11  ;;  %370 = vmatprep.subr.mxu1 %v182_v43 }
  0x18   :  { %341 = vmatprep.subr.mxu0 %v32_v12  ;;  %371 = vmatpush3.msra.mxu1 %v182_v43 }
  0x19   :  { %342 = vmatpush3.msra.mxu0 %v32_v12  ;;  %372 = vmatprep.subr.mxu1 %v181_v44 }
  0x1a   :  { %343 = vmatprep.subr.mxu0 %v31_v13  ;;  %373 = vmatpush3.msra.mxu1 %v181_v44 }
  0x1b   :  { %344 = vmatpush3.msra.mxu0 %v31_v13  ;;  %374 = vmatprep.subr.mxu1 %v180_v45 }
  0x1c   :  { %345 = vmatprep.subr.mxu0 %v30_v14  ;;  %375 = vmatpush3.msra.mxu1 %v180_v45 }
  0x1d   :  { %346 = vmatpush3.msra.mxu0 %v30_v14  ;;  %376 = vmatprep.subr.mxu1 %v179_v46 }
  0x1e   :  { %347 = vmatprep.subr.mxu0 %v29_v15  ;;  %377 = vmatpush3.msra.mxu1 %v179_v46 }
  0x1f   :  { %348 = vmatpush3.msra.mxu0 %v29_v15  ;;  %378 = vmatprep.subr.mxu1 %v178_v47 }
  0x20   :  { %349 = vmatprep.subr.mxu0 %v28_v16  ;;  %379 = vmatpush3.msra.mxu1 %v178_v47 }
  0x21   :  { %350 = vmatpush3.msra.mxu0 %v28_v16  ;;  %380 = vmatprep.subr.mxu1 %v177_v48 }
  0x22   :  { %352 = vmatmul.mubr.f32.vlgmr.msra.gmra.mxu0 %v27_v17  ;;  %381 = vmatpush3.msra.mxu1 %v177_v48 }
  0x23   :  { %382 = vmatprep.subr.mxu1 %v176_v49 }
  0x24   :  { %383 = vmatpush3.msra.mxu1 %v176_v49 }
  0x25   :  { %384 = vmatprep.subr.mxu1 %v175_v50 }
  0x26   :  { %385 = vmatpush3.msra.mxu1 %v175_v50 }
  0xe2   :  { %v353_v18 = vpop.f32.mrf.mxu0 }
  0xe3   :  { %v123_v22 = vadd.f32 %v353_v18, %v279_v19 }
  0xe4   :  { %v117_v20 = vpop.f32.mrf.mxu0 }
  0xe5   :  { %v118_v21 = vadd.f32 %v279_v19, %v117_v20 }
  0xe7   :  { %126 = vadd.xlane.f32.xlu0 %v118_v21 }
  0xeb   :  { %128 = vadd.xlane.f32.xlu0 %v123_v22 }
 0x170   :  { %v127_v26 = vpop.xlane.xlu0 %126 }
 0x171   :  { %v130_v27 = vmul.f32 0.03125, %v127_v26 }
 0x173   :  { %v493_v28 = vsub.f32 %v118_v21, %v130_v27 }
 0x174   :  { %v129_v29 = vpop.xlane.xlu0 %128 }
 0x175   :  { %v131_v30 = vmul.f32 0.03125, %v129_v29  ;;  %v139_v31 = vsel %vm136_vm0, %v493_v28, 0.0 }
 0x176   :  { %v141_v32 = vmul.f32 %v139_v31, %v139_v31 }
 0x177   :  { %v496_v33 = vsub.f32 %v123_v22, %v131_v30 }
 0x178   :  { %143 = vadd.xlane.f32.xlu1 %v141_v32 }
 0x179   :  { %v140_v34 = vsel %vm136_vm0, %v496_v33, 0.0 }
 0x17a   :  { %v142_v35 = vmul.f32 %v140_v34, %v140_v34 }
 0x17c   :  { %145 = vadd.xlane.f32.xlu1 %v142_v35 }
 0x201   :  { %v144_v51 = vpop.xlane.xlu1 %143 }
 0x202   :  { %v147_v52 = vmul.f32 0.03125, %v144_v51 }
 0x204   :  { %v149_v53 = vadd.f32 1e-05, %v147_v52 }
 0x205   :  { %v146_v54 = vpop.xlane.xlu1 %145 }
 0x206   :  { %389 = vrsqrt.f32 %v149_v53  ;;  %v148_v55 = vmul.f32 0.03125, %v146_v54 }
 0x208   :  { %v150_v56 = vadd.f32 1e-05, %v148_v55 }
 0x20a   :  { %391 = vrsqrt.f32 %v150_v56 }
 0x213   :  { %v390_v57 = vpop.eup %389 }
 0x214   :  { %v153_v59 = vmul.f32 %v390_v57, %v493_v28 }
 0x216   :  { %v162_v61 = vmul.f32 %v280_v58, %v153_v59 }
 0x217   :  { %v392_v62 = vpop.eup %391 }
 0x218   :  { %v154_v63 = vmul.f32 %v392_v62, %v496_v33  ;;  %v171_v0 = vadd.f32 %v281_v60, %v162_v61 }
 0x21a   :  { %v163_v1 = vmul.f32 %v280_v58, %v154_v63  ;;  %v173_v2 = vmax.f32 %v171_v0, 0.0 }
 0x21c   :  { %v172_v3 = vadd.f32 %v281_v60, %v163_v1  ;;  %386 = vmatprep.mubr.f32.mxu1 %v173_v2 }
 0x21e   :  { %v174_v4 = vmax.f32 %v172_v3, 0.0 }
 0x220   :  { %387 = vmatmul.mubr.f32.vlgmr.msra.gmra.mxu1 %v174_v4 }
 0x2e0   :  { %v388_v6 = vpop.f32.mrf.mxu1 }
 0x2e1   :  { %v270_v7 = vadd.f32 %v388_v6, %v282_v5 }
 0x2e2   :  { %v264_v8 = vpop.f32.mrf.mxu1 }
 0x2e3   :  { %274 = vst [vmem:[%s568_s7 + $0x8] sm:$0xff] %v270_v7  ;;  %v265_v9 = vadd.f32 %v282_v5, %v264_v8 }
 0x2e5   :  { %273 = vst [vmem:[%s568_s7] sm:$0xff] %v265_v9 }

</bundles_post_ra>
